<compile_context>
chip_gen: v6e
topology: v6e:2x2x1
jax: 0.10.0
libtpu: 0.0.40
codegen_flags: <defaults>
</compile_context>

<pallas_src>
import functools

import jax
import jax.numpy as jnp
from jax.experimental import pallas as pl
from jax.experimental.pallas import tpu as pltpu

HIDDEN = 64
LANE = 128  # pad the output head to a lane-dense multiple of 128


def qnet_kernel(x_ref, w1_ref, b1_ref, w2_ref, b2_ref, w3_ref, b3_ref, out_ref):
    # Three matmuls + ReLUs fused; bf16 MXU inputs, f32 accumulation.
    x = x_ref[...]
    h1 = jnp.dot(x, w1_ref[...], preferred_element_type=jnp.float32) + b1_ref[...]
    h1 = jnp.maximum(h1, 0.0).astype(jnp.bfloat16)
    h2 = jnp.dot(h1, w2_ref[...], preferred_element_type=jnp.float32) + b2_ref[...]
    h2 = jnp.maximum(h2, 0.0).astype(jnp.bfloat16)
    out = jnp.dot(h2, w3_ref[...], preferred_element_type=jnp.float32) + b3_ref[...]
    out_ref[...] = out.astype(out_ref.dtype)


@jax.jit
def qnetwork_forward(x, w1, b1, w2, b2, w3, b3):
    """x: [B, state_dim] f32; weights [in, out]; biases [1, out]. Returns [B, action_dim] f32."""
    B, state_dim = x.shape
    hidden = w1.shape[1]
    action_dim = w3.shape[1]

    # ---- tile selection ----------------------------------------------------
    if B <= 1024:
        # single tile: whole (padded) batch in one kernel invocation
        block_b = ((B + 7) // 8) * 8          # sublane-aligned
    else:
        block_b = 1024                         # multiple of 256 -> clean MXU passes
    b_pad = pl.cdiv(B, block_b) * block_b

    # ---- dtype / padding plumbing (layout only, no semantic change) --------
    out_lanes = max(LANE, ((action_dim + LANE - 1) // LANE) * LANE)

    x_p = x.astype(jnp.bfloat16)
    if b_pad != B:
        x_p = jnp.pad(x_p, ((0, b_pad - B), (0, 0)))

    w1b = w1.astype(jnp.bfloat16)
    w2b = w2.astype(jnp.bfloat16)
    w3b = jnp.pad(w3.astype(jnp.bfloat16), ((0, 0), (0, out_lanes - action_dim)))
    b1f = b1.astype(jnp.float32)
    b2f = b2.astype(jnp.float32)
    b3f = jnp.pad(b3.astype(jnp.float32), ((0, 0), (0, out_lanes - action_dim)))

    grid = (b_pad // block_b,)

    in_specs = [
        pl.BlockSpec((block_b, state_dim), lambda i: (i, 0)),     # x  (tiled over batch)
        pl.BlockSpec((state_dim, hidden), lambda i: (0, 0)),      # w1 (resident)
        pl.BlockSpec((1, hidden), lambda i: (0, 0)),              # b1
        pl.BlockSpec((hidden, hidden), lambda i: (0, 0)),         # w2
        pl.BlockSpec((1, hidden), lambda i: (0, 0)),              # b2
        pl.BlockSpec((hidden, out_lanes), lambda i: (0, 0)),      # w3 (lane-padded)
        pl.BlockSpec((1, out_lanes), lambda i: (0, 0)),           # b3
    ]
    out_spec = pl.BlockSpec((block_b, out_lanes), lambda i: (i, 0))

    out_padded = pl.pallas_call(
        qnet_kernel,
        out_shape=jax.ShapeDtypeStruct((b_pad, out_lanes), jnp.float32),
        grid=grid,
        in_specs=in_specs,
        out_specs=out_spec,
        compiler_params=pltpu.CompilerParams(
            dimension_semantics=("parallel",),   # lets v7x shard batch tiles across its 2 TCs
        ),
    )(x_p, w1b, b1f, w2b, b2f, w3b, b3f)

    return out_padded[:B, :action_dim]


def init_params(key, state_dim, action_dim):
    """Deterministic init mimicking torch.nn.Linear (uniform +-1/sqrt(fan_in))."""
    k1, k2, k3, k4, k5, k6 = jax.random.split(key, 6)

    def lin_init(kw, kb, fan_in, fan_out):
        bound = 1.0 / jnp.sqrt(fan_in)
        w = jax.random.uniform(kw, (fan_in, fan_out), jnp.float32, -bound, bound)
        b = jax.random.uniform(kb, (1, fan_out), jnp.float32, -bound, bound)
        return w, b

    w1, b1 = lin_init(k1, k2, state_dim, HIDDEN)
    w2, b2 = lin_init(k3, k4, HIDDEN, HIDDEN)
    w3, b3 = lin_init(k5, k6, HIDDEN, action_dim)
    return w1, b1, w2, b2, w3, b3


def reference_forward_bf16(x, w1, b1, w2, b2, w3, b3):
    """Reference that follows the same dtype path as the kernel (bf16 MXU inputs, f32 acc)."""
    xb = x.astype(jnp.bfloat16)
    h1 = jnp.dot(xb, w1.astype(jnp.bfloat16), preferred_element_type=jnp.float32) + b1
    h1 = jnp.maximum(h1, 0.0).astype(jnp.bfloat16)
    h2 = jnp.dot(h1, w2.astype(jnp.bfloat16), preferred_element_type=jnp.float32) + b2
    h2 = jnp.maximum(h2, 0.0).astype(jnp.bfloat16)
    return jnp.dot(h2, w3.astype(jnp.bfloat16), preferred_element_type=jnp.float32) + b3


if __name__ == "__main__":
    key = jax.random.PRNGKey(0)
    batch, state_dim, action_dim = 8, 16, 4

    kx, kp, kx2 = jax.random.split(key, 3)
    x = jax.random.normal(kx, (batch, state_dim), jnp.float32)
    params = init_params(kp, state_dim, action_dim)

    # small-batch path (single tile, grid=(1,))
    out = qnetwork_forward(x, *params)
    out = jax.block_until_ready(out)
    assert out.shape == (batch, action_dim)
    ref = reference_forward_bf16(x, *params)
    assert jnp.allclose(out, ref, atol=2e-2, rtol=2e-2), "mismatch vs bf16 reference"

    # non-multiple batch exercises the cdiv/pad path (still small & fast)
    x2 = jax.random.normal(kx2, (300, state_dim), jnp.float32)
    out2 = jax.block_until_ready(qnetwork_forward(x2, *params))
    assert out2.shape == (300, action_dim)
    ref2 = reference_forward_bf16(x2, *params)
    assert jnp.allclose(out2, ref2, atol=2e-2, rtol=2e-2), "mismatch vs bf16 reference (padded batch)"

    print("KERNEL_OK")
</pallas_src>

<mosaic_0001>
module attributes {stable_mosaic.version = 11 : i64} {
  func.func @qnet_kernel(%arg0: i32, %arg1: memref<8x16xbf16, #tpu.memory_space<vmem>>, %arg2: memref<16x64xbf16, #tpu.memory_space<vmem>>, %arg3: memref<1x64xf32, #tpu.memory_space<vmem>>, %arg4: memref<64x64xbf16, #tpu.memory_space<vmem>>, %arg5: memref<1x64xf32, #tpu.memory_space<vmem>>, %arg6: memref<64x128xbf16, #tpu.memory_space<vmem>>, %arg7: memref<1x128xf32, #tpu.memory_space<vmem>>, %arg8: memref<8x128xf32, #tpu.memory_space<vmem>>) attributes {dimension_semantics = [#tpu.dimension_semantics<parallel>], iteration_bounds = array<i64: 1>, scalar_prefetch = 0 : i64, scratch_operands = 0 : i64, tpu.core_type = #tpu.core_type<tc>, window_params = [{transform_indices = @transform_0, window_bounds = array<i64: 8, 16>}, {pipeline_mode = #tpu.pipeline_mode<synchronous>, transform_indices = @transform_1, window_bounds = array<i64: 16, 64>}, {pipeline_mode = #tpu.pipeline_mode<synchronous>, transform_indices = @transform_2, window_bounds = array<i64: 1, 64>}, {pipeline_mode = #tpu.pipeline_mode<synchronous>, transform_indices = @transform_3, window_bounds = array<i64: 64, 64>}, {pipeline_mode = #tpu.pipeline_mode<synchronous>, transform_indices = @transform_4, window_bounds = array<i64: 1, 64>}, {pipeline_mode = #tpu.pipeline_mode<synchronous>, transform_indices = @transform_5, window_bounds = array<i64: 64, 128>}, {pipeline_mode = #tpu.pipeline_mode<synchronous>, transform_indices = @transform_6, window_bounds = array<i64: 1, 128>}, {transform_indices = @transform_7, window_bounds = array<i64: 8, 128>}]} {
    %c0 = arith.constant 0 : index
    %c0_0 = arith.constant 0 : index
    %0 = vector.load %arg1[%c0, %c0_0] : memref<8x16xbf16, #tpu.memory_space<vmem>>, vector<8x16xbf16>
    %c0_1 = arith.constant 0 : index
    %c0_2 = arith.constant 0 : index
    %1 = vector.load %arg2[%c0_1, %c0_2] : memref<16x64xbf16, #tpu.memory_space<vmem>>, vector<16x64xbf16>
    %cst = arith.constant dense<0.000000e+00> : vector<8x64xf32>
    %2 = tpu.matmul %0, %1, %cst {dimension_numbers = #tpu.dot_dimension_numbers<[1], [0], [0], [1], [0, 0, 1, 1], [], []>} : vector<8x16xbf16>, vector<16x64xbf16>, vector<8x64xf32> -> vector<8x64xf32>
    %c0_3 = arith.constant 0 : index
    %c0_4 = arith.constant 0 : index
    %3 = vector.load %arg3[%c0_3, %c0_4] : memref<1x64xf32, #tpu.memory_space<vmem>>, vector<1x64xf32>
    %4 = vector.broadcast %3 : vector<1x64xf32> to vector<8x64xf32>
    %5 = arith.addf %2, %4 : vector<8x64xf32>
    %cst_5 = arith.constant 0.000000e+00 : f32
    %6 = vector.broadcast %cst_5 : f32 to vector<8x64xf32>
    %7 = arith.maximumf %5, %6 : vector<8x64xf32>
    %8 = arith.truncf %7 : vector<8x64xf32> to vector<8x64xbf16>
    %c0_6 = arith.constant 0 : index
    %c0_7 = arith.constant 0 : index
    %9 = vector.load %arg4[%c0_6, %c0_7] : memref<64x64xbf16, #tpu.memory_space<vmem>>, vector<64x64xbf16>
    %cst_8 = arith.constant dense<0.000000e+00> : vector<8x64xf32>
    %10 = tpu.matmul %8, %9, %cst_8 {dimension_numbers = #tpu.dot_dimension_numbers<[1], [0], [0], [1], [0, 0, 1, 1], [], []>} : vector<8x64xbf16>, vector<64x64xbf16>, vector<8x64xf32> -> vector<8x64xf32>
    %c0_9 = arith.constant 0 : index
    %c0_10 = arith.constant 0 : index
    %11 = vector.load %arg5[%c0_9, %c0_10] : memref<1x64xf32, #tpu.memory_space<vmem>>, vector<1x64xf32>
    %12 = vector.broadcast %11 : vector<1x64xf32> to vector<8x64xf32>
    %13 = arith.addf %10, %12 : vector<8x64xf32>
    %cst_11 = arith.constant 0.000000e+00 : f32
    %14 = vector.broadcast %cst_11 : f32 to vector<8x64xf32>
    %15 = arith.maximumf %13, %14 : vector<8x64xf32>
    %16 = arith.truncf %15 : vector<8x64xf32> to vector<8x64xbf16>
    %c0_12 = arith.constant 0 : index
    %c0_13 = arith.constant 0 : index
    %17 = vector.load %arg6[%c0_12, %c0_13] : memref<64x128xbf16, #tpu.memory_space<vmem>>, vector<64x128xbf16>
    %cst_14 = arith.constant dense<0.000000e+00> : vector<8x128xf32>
    %18 = tpu.matmul %16, %17, %cst_14 {dimension_numbers = #tpu.dot_dimension_numbers<[1], [0], [0], [1], [0, 0, 1, 1], [], []>} : vector<8x64xbf16>, vector<64x128xbf16>, vector<8x128xf32> -> vector<8x128xf32>
    %c0_15 = arith.constant 0 : index
    %c0_16 = arith.constant 0 : index
    %19 = vector.load %arg7[%c0_15, %c0_16] : memref<1x128xf32, #tpu.memory_space<vmem>>, vector<1x128xf32>
    %20 = vector.broadcast %19 : vector<1x128xf32> to vector<8x128xf32>
    %21 = arith.addf %18, %20 : vector<8x128xf32>
    %c0_17 = arith.constant 0 : index
    %c0_18 = arith.constant 0 : index
    %22 = vector.load %arg8[%c0_17, %c0_18] : memref<8x128xf32, #tpu.memory_space<vmem>>, vector<8x128xf32>
    tpu.vector_store %arg8[%c0_17, %c0_18], %21 {strides = array<i32>} : memref<8x128xf32, #tpu.memory_space<vmem>>, vector<8x128xf32>,
    return
  }
  func.func @transform_0(%arg0: i32) -> (i32, i32) {
    %c0_i32 = arith.constant 0 : i32
    %c0_i32_0 = arith.constant 0 : i32
    return %arg0, %c0_i32 : i32, i32
  }
  func.func @transform_1(%arg0: i32) -> (i32, i32) {
    %c0_i32 = arith.constant 0 : i32
    %c0_i32_0 = arith.constant 0 : i32
    %c0_i32_1 = arith.constant 0 : i32
    return %c0_i32, %c0_i32_0 : i32, i32
  }
  func.func @transform_2(%arg0: i32) -> (i32, i32) {
    %c0_i32 = arith.constant 0 : i32
    %c0_i32_0 = arith.constant 0 : i32
    %c0_i32_1 = arith.constant 0 : i32
    return %c0_i32, %c0_i32_0 : i32, i32
  }
  func.func @transform_3(%arg0: i32) -> (i32, i32) {
    %c0_i32 = arith.constant 0 : i32
    %c0_i32_0 = arith.constant 0 : i32
    %c0_i32_1 = arith.constant 0 : i32
    return %c0_i32, %c0_i32_0 : i32, i32
  }
  func.func @transform_4(%arg0: i32) -> (i32, i32) {
    %c0_i32 = arith.constant 0 : i32
    %c0_i32_0 = arith.constant 0 : i32
    %c0_i32_1 = arith.constant 0 : i32
    return %c0_i32, %c0_i32_0 : i32, i32
  }
  func.func @transform_5(%arg0: i32) -> (i32, i32) {
    %c0_i32 = arith.constant 0 : i32
    %c0_i32_0 = arith.constant 0 : i32
    %c0_i32_1 = arith.constant 0 : i32
    return %c0_i32, %c0_i32_0 : i32, i32
  }
  func.func @transform_6(%arg0: i32) -> (i32, i32) {
    %c0_i32 = arith.constant 0 : i32
    %c0_i32_0 = arith.constant 0 : i32
    %c0_i32_1 = arith.constant 0 : i32
    return %c0_i32, %c0_i32_0 : i32, i32
  }
  func.func @transform_7(%arg0: i32) -> (i32, i32) {
    %c0_i32 = arith.constant 0 : i32
    %c0_i32_0 = arith.constant 0 : i32
    return %arg0, %c0_i32 : i32, i32
  }
}

</mosaic_0001>

<bundles_post_ra>
// kernel: qnetwork_forward.1
= control target key start
LH: loop header
LB: loop body
LE: loop exit
PB: predicated region body
PF: predicated region fallthrough
CT: control target
= control target key end

     0   :  { %v329_v0 = vmov 0.0   ;;  %vm330_vm0 = vmmov 0   ;;  %vm43_vm1 = vcmask 130048   ;;  %vm128_vm2 = vcmask 523264   ;;  %s415_s1 = inlined_call_operand.vmem [shape: bf16[16,64], index: 1, kind: input, shape index: {}]   ;;  %s416_s0 = inlined_call_operand.vmem [shape: bf16[8,16], index: 0, kind: input, shape index: {}]   ;;  %s417_s3 = inlined_call_operand.vmem [shape: bf16[64,64], index: 3, kind: input, shape index: {}]   ;;  %s418_s5 = inlined_call_operand.vmem [shape: bf16[64,128], index: 5, kind: input, shape index: {}]   ;;  %s419_s2 = inlined_call_operand.vmem [shape: f32[1,64], index: 2, kind: input, shape index: {}]   ;;  %s420_s4 = inlined_call_operand.vmem [shape: f32[1,64], index: 4, kind: input, shape index: {}]   ;;  %s421_s6 = inlined_call_operand.vmem [shape: f32[1,128], index: 6, kind: input, shape index: {}]   ;;  %s422_s7 = inlined_call_operand.vmem [shape: f32[8,128], index: 7, kind: output, shape index: {}]  }
   0x1   :  { %288 = vmatprep.subr.bf16.mxu0 %v329_v0  ;;  %v320_v1 = vld [vmem:[%s415_s1] sm:$0xff]   ;;  %290 = vmatprep.mubr.msk.bf16.mxu0 %vm330_vm0, %v329_v0  ;;  %v321_v3 = vld [vmem:[%s417_s3 + $0x18] sm:$0xff]   ;;  %v322_v4 = vld [vmem:[%s417_s3 + $0x10] sm:$0xff]  }
   0x2   :  { %v27_v2 = vld [vmem:[%s416_s0] sm:$0xf]  ;;  %294 = vmatprep.subr.bf16.mxu1 %v329_v0  ;;  %302 = vmatprep.mubr.msk.bf16.mxu1 %vm330_vm0, %v329_v0  ;;  %v323_v5 = vld [vmem:[%s417_s3 + $0x8] sm:$0xff]   ;;  %v325_v7 = vld [vmem:[%s418_s5 + $0x18] sm:$0xff]  }
   0x3   :  { %289 = vmatpush3.bf16.msra.mxu0 %v320_v1  ;;  %295 = vmatpush3.bf16.msra.mxu1 %v321_v3  ;;  %v324_v6 = vld [vmem:[%s417_s3] sm:$0xff]   ;;  %v326_v8 = vld [vmem:[%s418_s5 + $0x10] sm:$0xff]   ;;  %v327_v17 = vld [vmem:[%s418_s5 + $0x8] sm:$0xff]  }
   0x4   :  { %306 = vmatprep.subr.bf16.mxu0 %v329_v0  ;;  %296 = vmatprep.subr.bf16.mxu1 %v329_v0  ;;  %v261_v9 = vld [vmem:[%s419_s2] ss:$0 sm:$0xff] }
   0x5   :  { %v328_v18 = vld [vmem:[%s418_s5] sm:$0xff]  }
   0x6   :  { %291 = vmatmul.mubr.msk.bf16.vlgmr.msra.gmra.mxu0 %vm43_vm1, %v27_v2  ;;  %v264_v19 = vld [vmem:[%s420_s4] ss:$0 sm:$0xff] }
   0x7   :  { %314 = vmatprep.mubr.msk.bf16.mxu0 %vm330_vm0, %v329_v0  ;;  %297 = vmatpush3.bf16.msra.mxu1 %v322_v4  ;;  %v270_v27 = vld [vmem:[%s421_s6] ss:$0 sm:$0xff] }
   0x8   :  { %298 = vmatprep.subr.bf16.mxu1 %v329_v0  ;;  %307 = vmatpush3.bf16.msra.mxu0 %v325_v7 }
   0x9   :  { %308 = vmatprep.subr.bf16.mxu0 %v329_v0 }
   0xb   :  { %299 = vmatpush3.bf16.msra.mxu1 %v323_v5 }
   0xc   :  { %300 = vmatprep.subr.bf16.mxu1 %v329_v0  ;;  %309 = vmatpush3.bf16.msra.mxu0 %v326_v8 }
   0xd   :  { %310 = vmatprep.subr.bf16.mxu0 %v329_v0 }
   0xf   :  { %301 = vmatpush3.bf16.msra.mxu1 %v324_v6 }
  0x10   :  { %311 = vmatpush3.bf16.msra.mxu0 %v327_v17 }
  0x11   :  { %312 = vmatprep.subr.bf16.mxu0 %v329_v0 }
  0x14   :  { %313 = vmatpush3.bf16.msra.mxu0 %v328_v18 }
  0xc6   :  { %v81_v10 = vpop.f32.mrf.mxu0 }
  0xc7   :  { %v82_v11 = vadd.f32 %v261_v9, %v81_v10 }
  0xc8   :  { %v292_v12 = vpop.f32.mrf.mxu0 }
  0xc9   :  { %v87_v13 = vmax.f32 %v82_v11, 0.0 }
  0xca   :  { %v84_v14 = vpop.f32.mrf.mxu0 }
  0xcb   :  { %v88_v15 = vpack.c.bf16 %v87_v13, %v87_v13 }
  0xcc   :  { %v293_v16 = vpop.f32.mrf.mxu0 }
  0xcd   :  { %303 = vmatmul.mubr.msk.bf16.vlgmr.msra.gmra.mxu1 %vm128_vm2, %v88_v15 }
 0x18d   :  { %v166_v20 = vpop.f32.mrf.mxu1 }
 0x18e   :  { %v167_v21 = vadd.f32 %v264_v19, %v166_v20 }
 0x18f   :  { %v304_v22 = vpop.f32.mrf.mxu1 }
 0x190   :  { %v172_v23 = vmax.f32 %v167_v21, 0.0 }
 0x191   :  { %v169_v24 = vpop.f32.mrf.mxu1 }
 0x192   :  { %v173_v25 = vpack.c.bf16 %v172_v23, %v172_v23 }
 0x193   :  { %v305_v26 = vpop.f32.mrf.mxu1 }
 0x194   :  { %315 = vmatmul.mubr.msk.bf16.vlgmr.msra.gmra.mxu0 %vm128_vm2, %v173_v25 }
 0x254   :  { %v250_v28 = vpop.f32.mrf.mxu0 }
 0x255   :  { %v251_v29 = vadd.f32 %v270_v27, %v250_v28 }
 0x256   :  { %v316_v30 = vpop.f32.mrf.mxu0 }
 0x257   :  { %256 = vst [vmem:[%s422_s7] sm:$0xff] %v251_v29 }
 0x258   :  { %v253_v31 = vpop.f32.mrf.mxu0 }
 0x25a   :  { %v317_v32 = vpop.f32.mrf.mxu0 }

</bundles_post_ra>
